<compile_context>
chip_gen: v7x
topology: tpu7x:2x2x1
jax: 0.10.0
libtpu: 0.0.40
codegen_flags: <defaults>
</compile_context>

<pallas_src>
import functools

import jax
import jax.numpy as jnp
from jax.experimental import pallas as pl
from jax.experimental.pallas import tpu as pltpu

BN_EPS = 1e-5
LANES = 128


def _round_up(x, m):
    return -(-x // m) * m


def policy_kernel(B, S, BS, x_rows, n_out, act_ref, w_ref, probs_ref):
    # --- activation slab (one DMA) ---
    x = act_ref[0:BS, :]                    # [BS, 128], trip feats in lanes 0:Cin
    st = act_ref[x_rows:x_rows + B, :]      # [B, 128], state in lanes E:E+n_ob

    # --- per-channel constants (plane 5 of the weight slab, one row each) ---
    pre_gg = w_ref[5, 0:1, :]               # emb_bn gamma * mha_bn gamma
    pre_g1sq = w_ref[5, 1:2, :]             # emb_bn gamma ** 2
    b2 = w_ref[5, 2:3, :]                   # mha_bn beta
    g3 = w_ref[5, 3:4, :]                   # ff_bn gamma
    b3 = w_ref[5, 4:5, :]                   # ff_bn beta
    ib = w_ref[5, 5:6, :]                   # inner conv bias
    hb = w_ref[5, 6:7, :]                   # hidden Linear bias
    ob = w_ref[5, 7:8, :]                   # logits Linear bias

    inv_n = jnp.float32(1.0 / BS)

    # ---- AttNet ----
    # emb: Conv1d(C_in, E, 1) == per-position linear.  Its bias is a per-channel
    # constant cancelled exactly by emb_bn's mean subtraction -> not packed.
    t = jnp.dot(x, w_ref[0], preferred_element_type=jnp.float32)    # [BS, 128]

    # Fused emb_bn -> mha_bn (both training-mode BN over the same BS rows),
    # single-pass stats.  After bn1, per-channel mean == bn1_beta (cancels) and
    # biased var == g1^2 * v/(v+eps), so bn2 folds into one scale/shift.
    mu = jnp.sum(t, axis=0, keepdims=True) * inv_n
    ex2 = jnp.sum(t * t, axis=0, keepdims=True) * inv_n
    v = ex2 - mu * mu                                                # biased var
    rsig = jax.lax.rsqrt(v + BN_EPS)
    scale = pre_gg * jax.lax.rsqrt(pre_g1sq * v * rsig * rsig + BN_EPS)
    rs = rsig * scale                                                # [1, 128]
    h = (t - mu) * rs + b2                                           # == mha_bn(emb_bn(t))

    # feed-forward: outer(relu(inner(h))) + h, then ff_bn.
    # outer bias omitted: cancelled exactly by ff_bn's mean subtraction.
    ff = jnp.maximum(
        jnp.dot(h, w_ref[1], preferred_element_type=jnp.float32) + ib, 0.0)
    ff = jnp.dot(ff, w_ref[2], preferred_element_type=jnp.float32) + h
    mu3 = jnp.sum(ff, axis=0, keepdims=True) * inv_n
    ex23 = jnp.sum(ff * ff, axis=0, keepdims=True) * inv_n
    v3 = ex23 - mu3 * mu3
    s3 = jax.lax.rsqrt(v3 + BN_EPS) * g3
    ff = (ff - mu3) * s3 + b3                                        # ff_bn

    # torch.sum(output, 2): per-batch sum over the sequence axis.
    # [BS,128] -> [B,S,128] is vreg-aligned for S % 8 == 0; axis-1 sum is a
    # sublane reduction.
    attn = jnp.sum(ff.reshape(B, S, LANES), axis=1)                  # [B, 128]

    # ---- Policy head ----
    # cat((state, attn), 1) @ W1.T: attn lives in lanes 0:E, state was packed
    # into lanes E:E+n_ob, and w_ref[3] rows match that layout, so the concat
    # plus both partial matmuls collapse into one full-width dot.
    head_in = attn + st
    hid_act = jnp.maximum(
        jnp.dot(head_in, w_ref[3], preferred_element_type=jnp.float32) + hb, 0.0)
    logits = jnp.dot(hid_act, w_ref[4], preferred_element_type=jnp.float32) + ob
    logits = logits[:, :n_out]                                       # [B, n_out]

    # softmax over actions; exact reciprocal (denominator is only [B,1]).
    m = jnp.max(logits, axis=1, keepdims=True)
    e = jnp.exp(logits - m)
    probs_ref[...] = e / jnp.sum(e, axis=1, keepdims=True)


def policy_forward(state, emb_trip, packed):
    B, S, Cin = emb_trip.shape
    d = packed["dims"]
    E, n_ob, n_out = d["E"], d["n_ob"], d["n_out"]
    BS = B * S
    x_rows = _round_up(BS, 8)
    s_rows = _round_up(B, 8)

    # Single activation slab: rows 0:BS = flattened emb_trip (lanes 0:Cin),
    # rows x_rows:x_rows+B = state shifted to lanes E:E+n_ob.  Glue pads /
    # concat stay outside the kernel.
    x_part = jnp.pad(emb_trip.reshape(BS, Cin).astype(jnp.float32),
                     ((0, x_rows - BS), (0, LANES - Cin)))
    st_part = jnp.pad(state.astype(jnp.float32),
                      ((0, s_rows - B), (E, LANES - E - n_ob)))
    act = jnp.concatenate([x_part, st_part], axis=0)

    kernel = functools.partial(policy_kernel, B, S, BS, x_rows, n_out)
    vmem = lambda: pl.BlockSpec(memory_space=pltpu.MemorySpace.VMEM)
    return pl.pallas_call(
        kernel,
        out_shape=jax.ShapeDtypeStruct((B, n_out), jnp.float32),
        in_specs=[vmem(), vmem()],
        out_specs=vmem(),
    )(act, packed["wslab"])


def init_params(key, trip_emb, emb_dim, hid_dim, n_act, n_ob_space, filter_inner=64):
    """Parameters in the PyTorch module's native layout."""
    ks = jax.random.split(key, 16)

    def nrm(k, shape, scale):
        return (scale * jax.random.normal(k, shape)).astype(jnp.float32)

    p = {}
    # AttNet
    p["emb_w"] = nrm(ks[0], (emb_dim, trip_emb), (2.0 / (emb_dim + trip_emb)) ** 0.5)
    p["emb_b"] = nrm(ks[1], (emb_dim,), 0.1)        # cancelled exactly by emb_bn
    p["bn1_g"] = 1.0 + nrm(ks[2], (emb_dim,), 0.05)
    p["bn1_b"] = nrm(ks[3], (emb_dim,), 0.05)       # cancelled inside fused bn1->bn2
    p["bn2_g"] = 1.0 + nrm(ks[4], (emb_dim,), 0.05)
    p["bn2_b"] = nrm(ks[5], (emb_dim,), 0.05)
    p["bn3_g"] = 1.0 + nrm(ks[6], (emb_dim,), 0.05)
    p["bn3_b"] = nrm(ks[7], (emb_dim,), 0.05)
    p["inner_w"] = nrm(ks[8], (filter_inner, emb_dim), emb_dim ** -0.5)
    p["inner_b"] = nrm(ks[9], (filter_inner,), 0.1)
    p["outer_w"] = nrm(ks[10], (emb_dim, filter_inner), filter_inner ** -0.5)
    p["outer_b"] = nrm(ks[11], (emb_dim,), 0.1)     # cancelled exactly by ff_bn
    # Policy head: hidden = Linear(n_ob_space + emb_dim, hid_dim)
    p["w1"] = nrm(ks[12], (hid_dim, n_ob_space + emb_dim), (n_ob_space + emb_dim) ** -0.5)
    p["b1"] = nrm(ks[13], (hid_dim,), 0.1)
    p["w2"] = nrm(ks[14], (n_act - 1, hid_dim), hid_dim ** -0.5)
    p["b2"] = nrm(ks[15], (n_act - 1,), 0.1)
    return p


def pack_params(p, trip_emb, emb_dim, hid_dim, n_act, n_ob_space, filter_inner=64):
    """One-time host-side packing: pre-transpose, pad to [128,128] lane-dense
    planes, fold all per-channel constants into a single weight slab.

    NOTE: the dropped emb/outer biases, dropped emb_bn beta and the
    emb_bn->mha_bn fusion are exact ONLY for training-mode BatchNorm with batch
    statistics computed over this exact call's B*S rows (the reference module
    called directly, as in the spec).  Eval-mode running stats would need the
    raw parameters packed instead.
    """
    Cin, E, F = trip_emb, emb_dim, filter_inner
    hid, n_out, n_ob = hid_dim, n_act - 1, n_ob_space
    assert max(Cin, E, F, hid, n_out) <= LANES and E + n_ob <= LANES

    def plane(mat):
        r, c = mat.shape
        return jnp.pad(mat.astype(jnp.float32), ((0, LANES - r), (0, LANES - c)))

    w1 = p["w1"]
    # Merged hidden-Linear plane: rows 0:E multiply attn (lanes 0:E of head_in),
    # rows E:E+n_ob multiply state (packed into lanes E:E+n_ob of the act slab).
    w_head = jnp.zeros((LANES, LANES), jnp.float32)
    w_head = w_head.at[:E, :hid].set(w1[:, n_ob:].T)
    w_head = w_head.at[E:E + n_ob, :hid].set(w1[:, :n_ob].T)

    # Per-channel constant plane (rows 0..7); bn1 constants pre-multiplied so
    # the in-kernel fused-BN scale chain is shorter.
    g1 = p["bn1_g"]
    vec = jnp.zeros((LANES, LANES), jnp.float32)
    vec = vec.at[0, :E].set(g1 * p["bn2_g"])     # pre_gg
    vec = vec.at[1, :E].set(g1 * g1)             # pre_g1sq
    vec = vec.at[2, :E].set(p["bn2_b"])
    vec = vec.at[3, :E].set(p["bn3_g"])
    vec = vec.at[4, :E].set(p["bn3_b"])
    vec = vec.at[5, :F].set(p["inner_b"])
    vec = vec.at[6, :hid].set(p["b1"])
    vec = vec.at[7, :n_out].set(p["b2"])
    # (emb_b, bn1_b, outer_b intentionally not packed: see note above.)

    wslab = jnp.stack([
        plane(p["emb_w"].T),     # 0: [Cin, E]   Conv1d(trip_emb, E, 1)
        plane(p["inner_w"].T),   # 1: [E, F]     Conv1d(E, F, 1)
        plane(p["outer_w"].T),   # 2: [F, E]     Conv1d(F, E, 1)
        w_head,                  # 3: merged hidden Linear (attn + state rows)
        plane(p["w2"].T),        # 4: [hid, n_out] logits Linear
        vec,                     # 5: per-channel constants
    ], axis=0)                   # [6, 128, 128] f32 = 384 KiB

    dims = dict(Cin=Cin, E=E, F=F, n_ob=n_ob, hid=hid, n_out=n_out)
    return dict(wslab=wslab, dims=dims)


if __name__ == "__main__":
    # Small shapes consistent with the module (S kept a multiple of 8).
    B, S = 2, 8
    trip_emb, emb_dim, hid_dim = 4, 32, 32
    n_act, n_ob_space = 5, 6

    key = jax.random.PRNGKey(0)
    k_state, k_trip, k_params = jax.random.split(key, 3)

    state = jax.random.normal(k_state, (B, n_ob_space), dtype=jnp.float32)
    emb_trip = jax.random.normal(k_trip, (B, S, trip_emb), dtype=jnp.float32)

    raw_params = init_params(k_params, trip_emb, emb_dim, hid_dim, n_act, n_ob_space)
    packed = pack_params(raw_params, trip_emb, emb_dim, hid_dim, n_act, n_ob_space)

    probs = policy_forward(state, emb_trip, packed)
    probs = jax.block_until_ready(probs)

    assert probs.shape == (B, n_act - 1)
    assert bool(jnp.all(jnp.isfinite(probs)))
    assert bool(jnp.all(probs >= 0.0))
    # Exact softmax reciprocal -> row sums at f32 accuracy.
    assert bool(jnp.allclose(jnp.sum(probs, axis=1), 1.0, atol=1e-4))
    print("KERNEL_OK")
</pallas_src>

<mosaic_0001>
module attributes {stable_mosaic.version = 11 : i64} {
  func.func @policy_kernel(%arg0: memref<24x128xf32, #tpu.memory_space<vmem>>, %arg1: memref<6x128x128xf32, #tpu.memory_space<vmem>>, %arg2: memref<2x4xf32, #tpu.memory_space<vmem>>) attributes {dimension_semantics = [], scalar_prefetch = 0 : i64, scratch_operands = 0 : i64, tpu.core_type = #tpu.core_type<tc>} {
    %c0 = arith.constant 0 : index
    %c0_0 = arith.constant 0 : index
    %0 = vector.load %arg0[%c0, %c0_0] : memref<24x128xf32, #tpu.memory_space<vmem>>, vector<16x128xf32>
    %c16 = arith.constant 16 : index
    %c0_1 = arith.constant 0 : index
    %1 = vector.load %arg0[%c16, %c0_1] : memref<24x128xf32, #tpu.memory_space<vmem>>, vector<2x128xf32>
    %c5 = arith.constant 5 : index
    %c0_2 = arith.constant 0 : index
    %c0_3 = arith.constant 0 : index
    %2 = vector.load %arg1[%c5, %c0_2, %c0_3] : memref<6x128x128xf32, #tpu.memory_space<vmem>>, vector<1x1x128xf32>
    %3 = vector.shape_cast %2 : vector<1x1x128xf32> to vector<1x128xf32>
    %c5_4 = arith.constant 5 : index
    %c1 = arith.constant 1 : index
    %c0_5 = arith.constant 0 : index
    %4 = vector.load %arg1[%c5_4, %c1, %c0_5] : memref<6x128x128xf32, #tpu.memory_space<vmem>>, vector<1x1x128xf32>
    %5 = vector.shape_cast %4 : vector<1x1x128xf32> to vector<1x128xf32>
    %c5_6 = arith.constant 5 : index
    %c2 = arith.constant 2 : index
    %c0_7 = arith.constant 0 : index
    %6 = vector.load %arg1[%c5_6, %c2, %c0_7] : memref<6x128x128xf32, #tpu.memory_space<vmem>>, vector<1x1x128xf32>
    %7 = vector.shape_cast %6 : vector<1x1x128xf32> to vector<1x128xf32>
    %c5_8 = arith.constant 5 : index
    %c3 = arith.constant 3 : index
    %c0_9 = arith.constant 0 : index
    %8 = vector.load %arg1[%c5_8, %c3, %c0_9] : memref<6x128x128xf32, #tpu.memory_space<vmem>>, vector<1x1x128xf32>
    %9 = vector.shape_cast %8 : vector<1x1x128xf32> to vector<1x128xf32>
    %c5_10 = arith.constant 5 : index
    %c4 = arith.constant 4 : index
    %c0_11 = arith.constant 0 : index
    %10 = vector.load %arg1[%c5_10, %c4, %c0_11] : memref<6x128x128xf32, #tpu.memory_space<vmem>>, vector<1x1x128xf32>
    %11 = vector.shape_cast %10 : vector<1x1x128xf32> to vector<1x128xf32>
    %c5_12 = arith.constant 5 : index
    %c5_13 = arith.constant 5 : index
    %c0_14 = arith.constant 0 : index
    %12 = vector.load %arg1[%c5_12, %c5_13, %c0_14] : memref<6x128x128xf32, #tpu.memory_space<vmem>>, vector<1x1x128xf32>
    %13 = vector.shape_cast %12 : vector<1x1x128xf32> to vector<1x128xf32>
    %c5_15 = arith.constant 5 : index
    %c6 = arith.constant 6 : index
    %c0_16 = arith.constant 0 : index
    %14 = vector.load %arg1[%c5_15, %c6, %c0_16] : memref<6x128x128xf32, #tpu.memory_space<vmem>>, vector<1x1x128xf32>
    %15 = vector.shape_cast %14 : vector<1x1x128xf32> to vector<1x128xf32>
    %c5_17 = arith.constant 5 : index
    %c7 = arith.constant 7 : index
    %c0_18 = arith.constant 0 : index
    %16 = vector.load %arg1[%c5_17, %c7, %c0_18] : memref<6x128x128xf32, #tpu.memory_space<vmem>>, vector<1x1x128xf32>
    %17 = vector.shape_cast %16 : vector<1x1x128xf32> to vector<1x128xf32>
    %c0_19 = arith.constant 0 : index
    %c0_20 = arith.constant 0 : index
    %c0_21 = arith.constant 0 : index
    %18 = vector.load %arg1[%c0_19, %c0_20, %c0_21] : memref<6x128x128xf32, #tpu.memory_space<vmem>>, vector<1x128x128xf32>
    %19 = vector.shape_cast %18 : vector<1x128x128xf32> to vector<128x128xf32>
    %cst = arith.constant dense<0.000000e+00> : vector<16x128xf32>
    %20 = tpu.matmul %0, %19, %cst {dimension_numbers = #tpu.dot_dimension_numbers<[1], [0], [0], [1], [0, 0, 1, 1], [], []>} : vector<16x128xf32>, vector<128x128xf32>, vector<16x128xf32> -> vector<16x128xf32>
    %cst_22 = arith.constant dense<0.000000e+00> : vector<128xf32>
    %21 = vector.multi_reduction <add>, %20, %cst_22 [0] : vector<16x128xf32> to vector<128xf32>
    %22 = vector.shape_cast %21 : vector<128xf32> to vector<1x128xf32>
    %cst_23 = arith.constant 6.250000e-02 : f32
    %23 = vector.broadcast %cst_23 : f32 to vector<1x128xf32>
    %24 = arith.mulf %22, %23 : vector<1x128xf32>
    %25 = arith.mulf %20, %20 : vector<16x128xf32>
    %cst_24 = arith.constant dense<0.000000e+00> : vector<128xf32>
    %26 = vector.multi_reduction <add>, %25, %cst_24 [0] : vector<16x128xf32> to vector<128xf32>
    %27 = vector.shape_cast %26 : vector<128xf32> to vector<1x128xf32>
    %cst_25 = arith.constant 6.250000e-02 : f32
    %28 = vector.broadcast %cst_25 : f32 to vector<1x128xf32>
    %29 = arith.mulf %27, %28 : vector<1x128xf32>
    %30 = arith.mulf %24, %24 : vector<1x128xf32>
    %31 = arith.subf %29, %30 : vector<1x128xf32>
    %cst_26 = arith.constant 9.99999974E-6 : f32
    %32 = vector.broadcast %cst_26 : f32 to vector<1x128xf32>
    %33 = arith.addf %31, %32 : vector<1x128xf32>
    %34 = math.rsqrt %33 : vector<1x128xf32>
    %35 = arith.mulf %5, %31 : vector<1x128xf32>
    %36 = arith.mulf %35, %34 : vector<1x128xf32>
    %37 = arith.mulf %36, %34 : vector<1x128xf32>
    %cst_27 = arith.constant 9.99999974E-6 : f32
    %38 = vector.broadcast %cst_27 : f32 to vector<1x128xf32>
    %39 = arith.addf %37, %38 : vector<1x128xf32>
    %40 = math.rsqrt %39 : vector<1x128xf32>
    %41 = arith.mulf %3, %40 : vector<1x128xf32>
    %42 = arith.mulf %34, %41 : vector<1x128xf32>
    %43 = vector.broadcast %24 : vector<1x128xf32> to vector<16x128xf32>
    %44 = arith.subf %20, %43 : vector<16x128xf32>
    %45 = vector.broadcast %42 : vector<1x128xf32> to vector<16x128xf32>
    %46 = arith.mulf %44, %45 : vector<16x128xf32>
    %47 = vector.broadcast %7 : vector<1x128xf32> to vector<16x128xf32>
    %48 = arith.addf %46, %47 : vector<16x128xf32>
    %c1_28 = arith.constant 1 : index
    %c0_29 = arith.constant 0 : index
    %c0_30 = arith.constant 0 : index
    %49 = vector.load %arg1[%c1_28, %c0_29, %c0_30] : memref<6x128x128xf32, #tpu.memory_space<vmem>>, vector<1x128x128xf32>
    %50 = vector.shape_cast %49 : vector<1x128x128xf32> to vector<128x128xf32>
    %cst_31 = arith.constant dense<0.000000e+00> : vector<16x128xf32>
    %51 = tpu.matmul %48, %50, %cst_31 {dimension_numbers = #tpu.dot_dimension_numbers<[1], [0], [0], [1], [0, 0, 1, 1], [], []>} : vector<16x128xf32>, vector<128x128xf32>, vector<16x128xf32> -> vector<16x128xf32>
    %52 = vector.broadcast %13 : vector<1x128xf32> to vector<16x128xf32>
    %53 = arith.addf %51, %52 : vector<16x128xf32>
    %cst_32 = arith.constant 0.000000e+00 : f32
    %54 = vector.broadcast %cst_32 : f32 to vector<16x128xf32>
    %55 = arith.maximumf %53, %54 : vector<16x128xf32>
    %c2_33 = arith.constant 2 : index
    %c0_34 = arith.constant 0 : index
    %c0_35 = arith.constant 0 : index
    %56 = vector.load %arg1[%c2_33, %c0_34, %c0_35] : memref<6x128x128xf32, #tpu.memory_space<vmem>>, vector<1x128x128xf32>
    %57 = vector.shape_cast %56 : vector<1x128x128xf32> to vector<128x128xf32>
    %cst_36 = arith.constant dense<0.000000e+00> : vector<16x128xf32>
    %58 = tpu.matmul %55, %57, %cst_36 {dimension_numbers = #tpu.dot_dimension_numbers<[1], [0], [0], [1], [0, 0, 1, 1], [], []>} : vector<16x128xf32>, vector<128x128xf32>, vector<16x128xf32> -> vector<16x128xf32>
    %59 = arith.addf %58, %48 : vector<16x128xf32>
    %cst_37 = arith.constant dense<0.000000e+00> : vector<128xf32>
    %60 = vector.multi_reduction <add>, %59, %cst_37 [0] : vector<16x128xf32> to vector<128xf32>
    %61 = vector.shape_cast %60 : vector<128xf32> to vector<1x128xf32>
    %cst_38 = arith.constant 6.250000e-02 : f32
    %62 = vector.broadcast %cst_38 : f32 to vector<1x128xf32>
    %63 = arith.mulf %61, %62 : vector<1x128xf32>
    %64 = arith.mulf %59, %59 : vector<16x128xf32>
    %cst_39 = arith.constant dense<0.000000e+00> : vector<128xf32>
    %65 = vector.multi_reduction <add>, %64, %cst_39 [0] : vector<16x128xf32> to vector<128xf32>
    %66 = vector.shape_cast %65 : vector<128xf32> to vector<1x128xf32>
    %cst_40 = arith.constant 6.250000e-02 : f32
    %67 = vector.broadcast %cst_40 : f32 to vector<1x128xf32>
    %68 = arith.mulf %66, %67 : vector<1x128xf32>
    %69 = arith.mulf %63, %63 : vector<1x128xf32>
    %70 = arith.subf %68, %69 : vector<1x128xf32>
    %cst_41 = arith.constant 9.99999974E-6 : f32
    %71 = vector.broadcast %cst_41 : f32 to vector<1x128xf32>
    %72 = arith.addf %70, %71 : vector<1x128xf32>
    %73 = math.rsqrt %72 : vector<1x128xf32>
    %74 = arith.mulf %73, %9 : vector<1x128xf32>
    %75 = vector.broadcast %63 : vector<1x128xf32> to vector<16x128xf32>
    %76 = arith.subf %59, %75 : vector<16x128xf32>
    %77 = vector.broadcast %74 : vector<1x128xf32> to vector<16x128xf32>
    %78 = arith.mulf %76, %77 : vector<16x128xf32>
    %79 = vector.broadcast %11 : vector<1x128xf32> to vector<16x128xf32>
    %80 = arith.addf %78, %79 : vector<16x128xf32>
    %81 = vector.shape_cast %80 : vector<16x128xf32> to vector<2x8x128xf32>
    %cst_42 = arith.constant dense<0.000000e+00> : vector<2x128xf32>
    %82 = vector.multi_reduction <add>, %81, %cst_42 [1] : vector<2x8x128xf32> to vector<2x128xf32>
    %83 = arith.addf %82, %1 : vector<2x128xf32>
    %c3_43 = arith.constant 3 : index
    %c0_44 = arith.constant 0 : index
    %c0_45 = arith.constant 0 : index
    %84 = vector.load %arg1[%c3_43, %c0_44, %c0_45] : memref<6x128x128xf32, #tpu.memory_space<vmem>>, vector<1x128x128xf32>
    %85 = vector.shape_cast %84 : vector<1x128x128xf32> to vector<128x128xf32>
    %cst_46 = arith.constant dense<0.000000e+00> : vector<2x128xf32>
    %86 = tpu.matmul %83, %85, %cst_46 {dimension_numbers = #tpu.dot_dimension_numbers<[1], [0], [0], [1], [0, 0, 1, 1], [], []>} : vector<2x128xf32>, vector<128x128xf32>, vector<2x128xf32> -> vector<2x128xf32>
    %87 = vector.broadcast %15 : vector<1x128xf32> to vector<2x128xf32>
    %88 = arith.addf %86, %87 : vector<2x128xf32>
    %cst_47 = arith.constant 0.000000e+00 : f32
    %89 = vector.broadcast %cst_47 : f32 to vector<2x128xf32>
    %90 = arith.maximumf %88, %89 : vector<2x128xf32>
    %c4_48 = arith.constant 4 : index
    %c0_49 = arith.constant 0 : index
    %c0_50 = arith.constant 0 : index
    %91 = vector.load %arg1[%c4_48, %c0_49, %c0_50] : memref<6x128x128xf32, #tpu.memory_space<vmem>>, vector<1x128x128xf32>
    %92 = vector.shape_cast %91 : vector<1x128x128xf32> to vector<128x128xf32>
    %cst_51 = arith.constant dense<0.000000e+00> : vector<2x128xf32>
    %93 = tpu.matmul %90, %92, %cst_51 {dimension_numbers = #tpu.dot_dimension_numbers<[1], [0], [0], [1], [0, 0, 1, 1], [], []>} : vector<2x128xf32>, vector<128x128xf32>, vector<2x128xf32> -> vector<2x128xf32>
    %94 = vector.broadcast %17 : vector<1x128xf32> to vector<2x128xf32>
    %95 = arith.addf %93, %94 : vector<2x128xf32>
    %96 = vector.extract_strided_slice %95 {offsets = [0, 0], sizes = [2, 4], strides = [1, 1]} : vector<2x128xf32> to vector<2x4xf32>
    %cst_52 = arith.constant dense<0xFF800000> : vector<2xf32>
    %97 = vector.multi_reduction <maximumf>, %96, %cst_52 [1] : vector<2x4xf32> to vector<2xf32>
    %98 = vector.shape_cast %97 : vector<2xf32> to vector<2x1xf32>
    %99 = vector.broadcast %98 : vector<2x1xf32> to vector<2x4xf32>
    %100 = arith.subf %96, %99 : vector<2x4xf32>
    %101 = math.exp %100 : vector<2x4xf32>
    %cst_53 = arith.constant dense<0.000000e+00> : vector<2xf32>
    %102 = vector.multi_reduction <add>, %101, %cst_53 [1] : vector<2x4xf32> to vector<2xf32>
    %103 = vector.shape_cast %102 : vector<2xf32> to vector<2x1xf32>
    %104 = vector.broadcast %103 : vector<2x1xf32> to vector<2x4xf32>
    %105 = arith.divf %101, %104 : vector<2x4xf32>
    %c0_54 = arith.constant 0 : index
    %c0_55 = arith.constant 0 : index
    %106 = vector.load %arg2[%c0_54, %c0_55] : memref<2x4xf32, #tpu.memory_space<vmem>>, vector<2x4xf32>
    tpu.vector_store %arg2[%c0_54, %c0_55], %105 {strides = array<i32>} : memref<2x4xf32, #tpu.memory_space<vmem>>, vector<2x4xf32>,
    return
  }
}

</mosaic_0001>

<bundles_post_ra>
// kernel: tpu_custom_call.1
= control target key start
LH: loop header
LB: loop body
LE: loop exit
PB: predicated region body
PF: predicated region fallthrough
CT: control target
= control target key end

     0   :  { %7 = vsyncpa [#allocation3], 0  ;;  %s1244_s0 = inlined_call_operand.hbm [shape: f32[24,128], index: 0, kind: input, shape index: {}]   ;;  %s1245_s1 = inlined_call_operand.hbm [shape: f32[6,128,128], index: 1, kind: input, shape index: {}]   ;;  %s1246_s2 = inlined_call_operand.hbm [shape: f32[2,4], index: 2, kind: output, shape index: {}]  }
   0x1   :  { %8 = vsyncpa [#allocation6], 0 }
   0x2   :  { %9 = vsyncpa [#allocation4], 0  ;;  %s1151_s9 = smov [#allocation2]   ;;  %s1079_s13 = scalar_lea.hbm %s1244_s0, 384 }
   0x3   :  { %s15_s10 = sshll.u32 %s1151_s9, 4  ;;  %p1080_p0 = scmp.ne.s32.totalorder %s1244_s0, %s1079_s13  ;;  %s16_s10 = int_to_ptr.vmem [resolvable:$true] %s15_s10 }
   0x4   :  { %p1083_p1 = scmp.lt.u32.totalorder %s1079_s13, %s1244_s0 }
   0x6   :  { %p1085_p2 = pnand %p1083_p1, %p1080_p0 }
   0x8   :  { %1088 = shalt.err (!%p1085_p2)
}
   0x9   :  { %s1089_s18 = scalar_lea.vmem %s16_s10, 384  ;;  %p1094_p4 = scmp.lt.s32.totalorder %s16_s10, %s16_s10 }
   0xa   :  { %p1090_p3 = scmp.ne.s32.totalorder %s16_s10, %s1089_s18  ;;  %p1095_p5 = scmp.lt.s32.totalorder %s1089_s18, %s1089_s18 }
   0xc   :  { %p1096_p6 = por %p1095_p5, %p1094_p4 }
   0xe   :  { %p1097_p7 = pnand %p1096_p6, %p1090_p3 }
  0x10   :  { %1100 = shalt.err (!%p1097_p7)
}
  0x11   :  { %s1152_s19 = smov 128   ;;  %s1153_s20 = smov 8  }
  0x12   :  { %21 = dma.hbm_to_vmem [thread:$0]  %s1244_s0, 384, %s16_s10, [#allocation3], %s1152_s19, %s1152_s19, %s1153_s20  }
  0x13   :  { %s1154_s23 = smov [#allocation5]   ;;  %s1101_s27 = scalar_lea.hbm %s1245_s1, 12288 }
  0x14   :  { %s27_s24 = sshll.u32 %s1154_s23, 4  ;;  %p1102_p8 = scmp.ne.s32.totalorder %s1245_s1, %s1101_s27  ;;  %s28_s24 = int_to_ptr.vmem [resolvable:$true] %s27_s24 }
  0x15   :  { %p1105_p9 = scmp.lt.u32.totalorder %s1101_s27, %s1245_s1 }
  0x17   :  { %p1107_p10 = pnand %p1105_p9, %p1102_p8 }
  0x19   :  { %1110 = shalt.err (!%p1107_p10)
}
  0x1a   :  { %s1111_s4 = scalar_lea.vmem %s28_s24, 12288  ;;  %p1116_p12 = scmp.lt.s32.totalorder %s28_s24, %s28_s24 }
  0x1b   :  { %p1112_p11 = scmp.ne.s32.totalorder %s28_s24, %s1111_s4  ;;  %p1117_p13 = scmp.lt.s32.totalorder %s1111_s4, %s1111_s4 }
  0x1d   :  { %p1118_p0 = por %p1117_p13, %p1116_p12 }
  0x1f   :  { %p1119_p1 = pnand %p1118_p0, %p1112_p11 }
  0x21   :  { %1122 = shalt.err (!%p1119_p1)
}
  0x22   :  { %33 = dma.hbm_to_vmem [thread:$0]  %s1245_s1, 12288, %s28_s24, [#allocation6], %s1152_s19, %s1152_s19, %s1153_s20  }
  0x23   :  { %1145 = dma.done.wait [#allocation3], 384  }
  0x24   :  { %1146 = vsyncadd [#allocation3], 4294966912 }
  0x25   :  { %1147 = dma.done.wait [#allocation6], 12288  }
  0x26   :  { %1148 = vsyncadd [#allocation6], 4294955008  ;;  %v52_v0 = vld [vmem:[#allocation5] sm:$0xff]  ;;  %v53_v1 = vld [vmem:[#allocation5 + $0x8] sm:$0xff]  ;;  %vm1156_vm0 = vmmov 0   ;;  %vm455_vm1 = vcmask 1041409  }
  0x27   :  { %v54_v2 = vld [vmem:[#allocation5 + $0x10] sm:$0xff]  ;;  %v917_v3 = vpack.c.bf16 %v53_v1, %v52_v0  ;;  %v55_v4 = vld [vmem:[#allocation5 + $0x18] sm:$0xff]  ;;  %v56_v6 = vld [vmem:[#allocation5 + $0x20] sm:$0xff]  ;;  %vm620_vm2 = vcmask 25600   ;;  %s1158_s1 = smov [#allocation7]  }
  0x28   :  { %v921_v5 = vpack.c.bf16 %v55_v4, %v54_v2  ;;  %v57_v7 = vld [vmem:[#allocation5 + $0x28] sm:$0xff]  ;;  %v58_v10 = vld [vmem:[#allocation5 + $0x30] sm:$0xff]  ;;  %v59_v11 = vld [vmem:[#allocation5 + $0x38] sm:$0xff]  ;;  %s639_s6 = sshll.u32 %s1158_s1, 4  ;;  %s640_s6 = int_to_ptr.vmem [resolvable:$true] %s639_s6 }
  0x29   :  { %918 = vmatprep.subr.bf16.mxu0 %v917_v3  ;;  %v925_v8 = vpack.c.bf16 %v57_v7, %v56_v6  ;;  %v40_v9 = vld [vmem:[#allocation2] sm:$0xff]  ;;  %v929_v12 = vpack.c.bf16 %v59_v11, %v58_v10  ;;  %v60_v13 = vld [vmem:[#allocation5 + $0x40] sm:$0xff]  ;;  %v62_v16 = vld [vmem:[#allocation5 + $0x50] sm:$0xff]  ;;  %s1123_s7 = scalar_lea.vmem %s640_s6, 32  ;;  %p1128_p3 = scmp.lt.s32.totalorder %s640_s6, %s640_s6 }
  0x2a   :  { %920 = vmatpush3.bf16.msra.mxu0 %v917_v3  ;;  %774 = vmatprep.mubr.f32.mxu0 %v40_v9  ;;  %v61_v14 = vld [vmem:[#allocation5 + $0x48] sm:$0xff]  ;;  %v63_v17 = vld [vmem:[#allocation5 + $0x58] sm:$0xff]  ;;  %v64_v19 = vld [vmem:[#allocation5 + $0x60] sm:$0xff]  ;;  %p1124_p2 = scmp.ne.s32.totalorder %s640_s6, %s1123_s7  ;;  %p1129_p4 = scmp.lt.s32.totalorder %s1123_s7, %s1123_s7 }
  0x2b   :  { %922 = vmatprep.subr.bf16.mxu0 %v921_v5  ;;  %v933_v15 = vpack.c.bf16 %v61_v14, %v60_v13  ;;  %v937_v18 = vpack.c.bf16 %v63_v17, %v62_v16  ;;  %v65_v20 = vld [vmem:[#allocation5 + $0x68] sm:$0xff]  ;;  %v66_v22 = vld [vmem:[#allocation5 + $0x70] sm:$0xff]  ;;  %v67_v23 = vld [vmem:[#allocation5 + $0x78] sm:$0xff] }
  0x2c   :  { %v941_v21 = vpack.c.bf16 %v65_v20, %v64_v19  ;;  %v945_v24 = vpack.c.bf16 %v67_v23, %v66_v22  ;;  %v41_v25 = vld [vmem:[#allocation2 + $0x8] sm:$0xff]  ;;  %v187_v26 = vld [vmem:[#allocation5 + $0x80] sm:$0xff]  ;;  %v188_v27 = vld [vmem:[#allocation5 + $0x88] sm:$0xff]  ;;  %p1130_p5 = por %p1129_p4, %p1128_p3 }
  0x2d   :  { %v949_v28 = vpack.c.bf16 %v188_v27, %v187_v26  ;;  %v189_v29 = vld [vmem:[#allocation5 + $0x90] sm:$0xff]  ;;  %v190_v30 = vld [vmem:[#allocation5 + $0x98] sm:$0xff]  ;;  %v191_v32 = vld [vmem:[#allocation5 + $0xa0] sm:$0xff] }
  0x2e   :  { %924 = vmatpush3.bf16.msra.mxu0 %v921_v5  ;;  %v953_v31 = vpack.c.bf16 %v190_v30, %v189_v29  ;;  %v192_v33 = vld [vmem:[#allocation5 + $0xa8] sm:$0xff]  ;;  %v193_v35 = vld [vmem:[#allocation5 + $0xb0] sm:$0xff]  ;;  %v194_v36 = vld [vmem:[#allocation5 + $0xb8] sm:$0xff]  ;;  %p1131_p6 = pnand %p1130_p5, %p1124_p2 }
  0x2f   :  { %926 = vmatprep.subr.bf16.mxu0 %v925_v8  ;;  %950 = vmatprep.subr.bf16.mxu1 %v949_v28  ;;  %v957_v34 = vpack.c.bf16 %v192_v33, %v191_v32  ;;  %v195_v37 = vld [vmem:[#allocation5 + $0xc0] sm:$0xff]  ;;  %v961_v38 = vpack.c.bf16 %v194_v36, %v193_v35  ;;  %v196_v39 = vld [vmem:[#allocation5 + $0xc8] sm:$0xff]  ;;  %v197_v41 = vld [vmem:[#allocation5 + $0xd0] sm:$0xff] }
  0x30   :  { %952 = vmatpush3.bf16.msra.mxu1 %v949_v28  ;;  %v965_v40 = vpack.c.bf16 %v196_v39, %v195_v37  ;;  %v198_v42 = vld [vmem:[#allocation5 + $0xd8] sm:$0xff]  ;;  %v199_v44 = vld [vmem:[#allocation5 + $0xe0] sm:$0xff]  ;;  %v200_v45 = vld [vmem:[#allocation5 + $0xe8] sm:$0xff] }
  0x31   :  { %954 = vmatprep.subr.bf16.mxu1 %v953_v31  ;;  %v969_v43 = vpack.c.bf16 %v198_v42, %v197_v41  ;;  %v973_v46 = vpack.c.bf16 %v200_v45, %v199_v44  ;;  %v201_v47 = vld [vmem:[#allocation5 + $0xf0] sm:$0xff]  ;;  %v202_v48 = vld [vmem:[#allocation5 + $0xf8] sm:$0xff]  ;;  %v285_v50 = vld [vmem:[#allocation5 + $0x100] sm:$0xff] }
  0x32   :  { %928 = vmatpush3.bf16.msra.mxu0 %v925_v8  ;;  %v977_v49 = vpack.c.bf16 %v202_v48, %v201_v47  ;;  %v286_v51 = vld [vmem:[#allocation5 + $0x108] sm:$0xff]  ;;  %v287_v52 = vld [vmem:[#allocation5 + $0x110] sm:$0xff]  ;;  %v288_v54 = vld [vmem:[#allocation5 + $0x118] sm:$0xff] }
  0x33   :  { %930 = vmatprep.subr.bf16.mxu0 %v929_v12  ;;  %v981_v53 = vpack.c.bf16 %v286_v51, %v285_v50  ;;  %v985_v55 = vpack.c.bf16 %v288_v54, %v287_v52  ;;  %v289_v56 = vld [vmem:[#allocation5 + $0x120] sm:$0xff]  ;;  %v290_v57 = vld [vmem:[#allocation5 + $0x128] sm:$0xff]  ;;  %v291_v59 = vld [vmem:[#allocation5 + $0x130] sm:$0xff] }
  0x34   :  { %956 = vmatpush3.bf16.msra.mxu1 %v953_v31  ;;  %v989_v58 = vpack.c.bf16 %v290_v57, %v289_v56  ;;  %v292_v60 = vld [vmem:[#allocation5 + $0x138] sm:$0xff]  ;;  %v293_v62 = vld [vmem:[#allocation5 + $0x140] sm:$0xff]  ;;  %v294_v63 = vld [vmem:[#allocation5 + $0x148] sm:$0xff] }
  0x35   :  { %958 = vmatprep.subr.bf16.mxu1 %v957_v34  ;;  %v993_v61 = vpack.c.bf16 %v292_v60, %v291_v59  ;;  %v997_v0 = vpack.c.bf16 %v294_v63, %v293_v62  ;;  %v295_v1 = vld [vmem:[#allocation5 + $0x150] sm:$0xff]  ;;  %v296_v2 = vld [vmem:[#allocation5 + $0x158] sm:$0xff]  ;;  %v297_v4 = vld [vmem:[#allocation5 + $0x160] sm:$0xff] }
  0x36   :  { %932 = vmatpush3.bf16.msra.mxu0 %v929_v12  ;;  %v1001_v3 = vpack.c.bf16 %v296_v2, %v295_v1  ;;  %v298_v5 = vld [vmem:[#allocation5 + $0x168] sm:$0xff]  ;;  %v45_v32 = vld [vmem:[#allocation5 + $0x281] sm:$0x1]  ;;  %v299_v51 = vld [vmem:[#allocation5 + $0x170] sm:$0xff] }
  0x37   :  { %934 = vmatprep.subr.bf16.mxu0 %v933_v15  ;;  %v1005_v6 = vpack.c.bf16 %v298_v5, %v297_v4  ;;  %v300_v52 = vld [vmem:[#allocation5 + $0x178] sm:$0xff]  ;;  %v650_v54 = vld [vmem:[#allocation5 + $0x285] ss:$0 sm:$0xff]  ;;  %v433_v62 = vld [vmem:[#allocation5 + $0x188] sm:$0xff] }
  0x38   :  { %960 = vmatpush3.bf16.msra.mxu1 %v957_v34  ;;  %v434_v1 = vld [vmem:[#allocation5 + $0x190] sm:$0xff]  ;;  %v435_v2 = vld [vmem:[#allocation5 + $0x198] sm:$0xff]  ;;  %v436_v4 = vld [vmem:[#allocation5 + $0x1a0] sm:$0xff] }
  0x39   :  { %962 = vmatprep.subr.bf16.mxu1 %v961_v38  ;;  %v437_v5 = vld [vmem:[#allocation5 + $0x1a8] sm:$0xff] }
  0x3a   :  { %936 = vmatpush3.bf16.msra.mxu0 %v933_v15 }
  0x3b   :  { %938 = vmatprep.subr.bf16.mxu0 %v937_v18 }
  0x3c   :  { %964 = vmatpush3.bf16.msra.mxu1 %v961_v38  ;;  %v174_v38 = vlaneseq }
  0x3d   :  { %966 = vmatprep.subr.bf16.mxu1 %v965_v40 }
  0x3e   :  { %940 = vmatpush3.bf16.msra.mxu0 %v937_v18  ;;  %v1198_v39 = vshrl.u32 %v174_v38, 7  ;;  %v540_v38 = vld [vmem:[#allocation5 + $0x250] sm:$0xff] }
  0x3f   :  { %942 = vmatprep.subr.bf16.mxu0 %v941_v21 }
  0x40   :  { %968 = vmatpush3.bf16.msra.mxu1 %v965_v40  ;;  %v44_v40 = vld [vmem:[#allocation5 + $0x280] sm:$0x1] }
  0x41   :  { %970 = vmatprep.subr.bf16.mxu1 %v969_v43 }
  0x42   :  { %944 = vmatpush3.bf16.msra.mxu0 %v941_v21 }
  0x43   :  { %946 = vmatprep.subr.bf16.mxu0 %v945_v24 }
  0x44   :  { %972 = vmatpush3.bf16.msra.mxu1 %v969_v43  ;;  %v176_v43 = vsub.s32 0, %v1198_v39 }
  0x45   :  { %974 = vmatprep.subr.bf16.mxu1 %v973_v46 }
  0x46   :  { %948 = vmatpush3.bf16.msra.mxu0 %v945_v24 }
  0x47   :  { %982 = vmatprep.subr.bf16.mxu0 %v981_v53 }
  0x48   :  { %976 = vmatpush3.bf16.msra.mxu1 %v973_v46  ;;  %v649_v46 = vld [vmem:[#allocation5 + $0x282] ss:$0 sm:$0xff] }
  0x49   :  { %775 = vmatmul.mubr.f32.vlgmr.msra.gmra.mrb[0].mxu0 %v41_v25  ;;  %978 = vmatprep.subr.bf16.mxu1 %v977_v49 }
  0x4a   :  { %984 = vmatpush3.bf16.msra.mxu0 %v981_v53  ;;  %v1009_v53 = vpack.c.bf16 %v300_v52, %v299_v51 }
  0x4b   :  { %986 = vmatprep.subr.bf16.mxu0 %v985_v55 }
  0x4c   :  { %980 = vmatpush3.bf16.msra.mxu1 %v977_v49 }
  0x4e   :  { %988 = vmatpush3.bf16.msra.mxu0 %v985_v55 }
  0x4f   :  { %990 = vmatprep.subr.bf16.mxu0 %v989_v58 }
  0x52   :  { %992 = vmatpush3.bf16.msra.mxu0 %v989_v58 }
  0x53   :  { %994 = vmatprep.subr.bf16.mxu0 %v993_v61 }
  0x56   :  { %996 = vmatpush3.bf16.msra.mxu0 %v993_v61  ;;  %v432_v61 = vld [vmem:[#allocation5 + $0x180] sm:$0xff] }
  0x57   :  { %998 = vmatprep.subr.bf16.mxu0 %v997_v0  ;;  %v1014_v63 = vpack.c.bf16 %v433_v62, %v432_v61 }
  0x5a   :  { %1000 = vmatpush3.bf16.msra.mxu0 %v997_v0  ;;  %v1155_v0 = vmov 0.0|0.0  }
  0x5b   :  { %1002 = vmatprep.subr.bf16.mxu0 %v1001_v3  ;;  %1013 = vmatprep.subr.bf16.mxu1 %v1155_v0 }
  0x5e   :  { %1004 = vmatpush3.bf16.msra.mxu0 %v1001_v3  ;;  %v1017_v3 = vpack.c.bf16 %v435_v2, %v434_v1 }
  0x5f   :  { %1006 = vmatprep.subr.bf16.mxu0 %v1005_v6 }
  0x62   :  { %1008 = vmatpush3.bf16.msra.mxu0 %v1005_v6  ;;  %v1020_v6 = vpack.c.bf16 %v437_v5, %v436_v4 }
  0x63   :  { %1010 = vmatprep.subr.bf16.mxu0 %v1009_v53 }
  0x66   :  { %1012 = vmatpush3.bf16.msra.mxu0 %v1009_v53 }
  0x67   :  { %1037 = vmatprep.subr.bf16.mxu0 %v1155_v0 }
 0x11c   :  { %v776_v7 = vpop.f32.mrb[0].mxu0 }
 0x11d   :  { %v152_v8 = vmul.f32 %v776_v7, %v776_v7  ;;  %v134_v9 = vpop.f32.mrb[1].mxu0 }
 0x11e   :  { %v143_v10 = vadd.f32 %v776_v7, %v134_v9  ;;  %v151_v11 = vmul.f32 %v134_v9, %v134_v9 }
 0x120   :  { %v144_v12 = vrot.slane %v143_v10, 4  ;;  %v153_v13 = vadd.f32 %v152_v8, %v151_v11  ;;  %v439_v8 = vld [vmem:[#allocation5 + $0x1b8] sm:$0xff]  ;;  %v441_v11 = vld [vmem:[#allocation5 + $0x1c8] sm:$0xff] }
 0x122   :  { %v145_v14 = vadd.f32 %v144_v12, %v143_v10  ;;  %v154_v15 = vrot.slane %v153_v13, 4  ;;  %v440_v10 = vld [vmem:[#allocation5 + $0x1c0] sm:$0xff] }
 0x123   :  { %v1026_v12 = vpack.c.bf16 %v441_v11, %v440_v10 }
 0x124   :  { %v146_v16 = vrot.slane %v145_v14, 2  ;;  %v155_v17 = vadd.f32 %v154_v15, %v153_v13  ;;  %v442_v13 = vld [vmem:[#allocation5 + $0x1d0] sm:$0xff] }
 0x126   :  { %v147_v18 = vadd.f32 %v146_v16, %v145_v14  ;;  %v156_v19 = vrot.slane %v155_v17, 2  ;;  %v443_v14 = vld [vmem:[#allocation5 + $0x1d8] sm:$0xff]  ;;  %v444_v16 = vld [vmem:[#allocation5 + $0x1e0] sm:$0xff] }
 0x127   :  { %v1029_v15 = vpack.c.bf16 %v443_v14, %v442_v13  ;;  %v651_v13 = vld [vmem:[#allocation5 + $0x284] ss:$0 sm:$0xff] }
 0x128   :  { %v148_v20 = vrot.slane %v147_v18, 1  ;;  %v157_v21 = vadd.f32 %v156_v19, %v155_v17  ;;  %v445_v17 = vld [vmem:[#allocation5 + $0x1e8] sm:$0xff] }
 0x129   :  { %v1032_v19 = vpack.c.bf16 %v445_v17, %v444_v16 }
 0x12a   :  { %v149_v22 = vadd.f32 %v148_v20, %v147_v18  ;;  %v158_v23 = vrot.slane %v157_v21, 1  ;;  %v1157_v18 = vmov 0.0   ;;  %v446_v20 = vld [vmem:[#allocation5 + $0x1f0] sm:$0xff] }
 0x12c   :  { %v150_v24 = vmul.f32 0.0625, %v149_v22  ;;  %v159_v25 = vadd.f32 %v158_v23, %v157_v21  ;;  %v447_v21 = vld [vmem:[#allocation5 + $0x1f8] sm:$0xff]  ;;  %v530_v23 = vld [vmem:[#allocation5 + $0x200] sm:$0xff] }
 0x12d   :  { %v1035_v22 = vpack.c.bf16 %v447_v21, %v446_v20 }
 0x12e   :  { %v160_v26 = vmul.f32 0.0625, %v159_v25  ;;  %v161_v27 = vmul.f32 %v150_v24, %v150_v24  ;;  %v172_v28 = vsub.f32 %v134_v9, %v150_v24  ;;  %v173_v29 = vsub.f32 %v776_v7, %v150_v24  ;;  %v438_v7 = vld [vmem:[#allocation5 + $0x1b0] sm:$0xff]  ;;  %v531_v24 = vld [vmem:[#allocation5 + $0x208] sm:$0xff] }
 0x12f   :  { %v1023_v9 = vpack.c.bf16 %v439_v8, %v438_v7  ;;  %v532_v25 = vld [vmem:[#allocation5 + $0x210] sm:$0xff] }
 0x130   :  { %v162_v30 = vsub.f32 %v160_v26, %v161_v27  ;;  %v1038_v26 = vpack.c.bf16 %v531_v24, %v530_v23  ;;  %v533_v27 = vld [vmem:[#allocation5 + $0x218] sm:$0xff] }
 0x131   :  { %v42_v24 = vld [vmem:[#allocation2 + $0x10] sm:$0x3] }
 0x132   :  { %v163_v31 = vadd.f32 1e-05, %v162_v30  ;;  %v165_v33 = vmul.f32 %v162_v30, %v45_v32  ;;  %v535_v30 = vld [vmem:[#allocation5 + $0x228] sm:$0xff]  ;;  %v536_v32 = vld [vmem:[#allocation5 + $0x230] sm:$0xff] }
 0x134   :  { %1069 = vrsqrt.f32 %v163_v31 }
 0x13e   :  { %v1070_v34 = vpop.eup %1069 }
 0x13f   :  { %v166_v35 = vmul.f32 %v1070_v34, %v165_v33  ;;  %v537_v33 = vld [vmem:[#allocation5 + $0x238] sm:$0xff] }
 0x141   :  { %v167_v36 = vmul.f32 %v1070_v34, %v166_v35  ;;  %v538_v35 = vld [vmem:[#allocation5 + $0x240] sm:$0xff] }
 0x143   :  { %v168_v37 = vadd.f32 1e-05, %v167_v36  ;;  %v539_v36 = vld [vmem:[#allocation5 + $0x248] sm:$0xff] }
 0x145   :  { %1071 = vrsqrt.f32 %v168_v37  ;;  %v1050_v37 = vpack.c.bf16 %v539_v36, %v538_v35  ;;  %v545_v35 = vld [vmem:[#allocation5 + $0x278] sm:$0xff] }
 0x14f   :  { %v1072_v41 = vpop.eup %1071 }
 0x150   :  { %v170_v42 = vmul.f32 %v1072_v41, %v44_v40  ;;  %v541_v40 = vld [vmem:[#allocation5 + $0x258] sm:$0xff] }
 0x151   :  { %v1053_v41 = vpack.c.bf16 %v541_v40, %v540_v38 }
 0x152   :  { %v171_v44 = vmul.f32 %v1070_v34, %v170_v42  ;;  %v1047_v34 = vpack.c.bf16 %v537_v33, %v536_v32  ;;  %v542_v42 = vld [vmem:[#allocation5 + $0x260] sm:$0xff] }
 0x154   :  { %v177_v45 = vrot.slane %v171_v44, %v176_v43  ;;  %v543_v44 = vld [vmem:[#allocation5 + $0x268] sm:$0xff] }
 0x156   :  { %v178_v47 = vmul.f32 %v177_v45, %v172_v28  ;;  %v179_v48 = vmul.f32 %v177_v45, %v173_v29  ;;  %v1041_v28 = vpack.c.bf16 %v533_v27, %v532_v25  ;;  %v534_v29 = vld [vmem:[#allocation5 + $0x220] sm:$0xff]  ;;  %v1056_v45 = vpack.c.bf16 %v543_v44, %v542_v42 }
 0x157   :  { %v1044_v31 = vpack.c.bf16 %v535_v30, %v534_v29  ;;  %v426_v29 = vrot.slane %v42_v24, 1  ;;  %v653_v44 = vld [vmem:[#allocation5 + $0x287] ss:$0 sm:$0xff] }
 0x158   :  { %v1203_v49 = vadd.f32 %v649_v46, %v178_v47  ;;  %v1205_v50 = vadd.f32 %v649_v46, %v179_v48 }
 0x15a   :  { %809 = vmatprep.mubr.f32.mxu1 %v1203_v49 }
 0x15b   :  { %810 = vmatmul.mubr.f32.vlgmr.msra.gmra.mrb[0].mxu1 %v1205_v50 }
 0x15c   :  { %1015 = vmatpush3.bf16.msra.mxu1 %v1014_v63  ;;  %879 = vmatprep.mubr.msk.f32.mxu1 %vm1156_vm0, %v1157_v18 }
 0x15d   :  { %1016 = vmatprep.subr.bf16.mxu1 %v1155_v0 }
 0x160   :  { %1018 = vmatpush3.bf16.msra.mxu1 %v1017_v3 }
 0x161   :  { %1019 = vmatprep.subr.bf16.mxu1 %v1155_v0 }
 0x164   :  { %1021 = vmatpush3.bf16.msra.mxu1 %v1020_v6 }
 0x165   :  { %1022 = vmatprep.subr.bf16.mxu1 %v1155_v0 }
 0x168   :  { %1024 = vmatpush3.bf16.msra.mxu1 %v1023_v9  ;;  %v47_v9 = vld [vmem:[#allocation5 + $0x283] sm:$0x1] }
 0x169   :  { %1025 = vmatprep.subr.bf16.mxu1 %v1155_v0 }
 0x16c   :  { %1027 = vmatpush3.bf16.msra.mxu1 %v1026_v12 }
 0x16d   :  { %1028 = vmatprep.subr.bf16.mxu1 %v1155_v0 }
 0x170   :  { %1030 = vmatpush3.bf16.msra.mxu1 %v1029_v15 }
 0x171   :  { %1031 = vmatprep.subr.bf16.mxu1 %v1155_v0 }
 0x174   :  { %1033 = vmatpush3.bf16.msra.mxu1 %v1032_v19 }
 0x175   :  { %1034 = vmatprep.subr.bf16.mxu1 %v1155_v0 }
 0x178   :  { %1036 = vmatpush3.bf16.msra.mxu1 %v1035_v22 }
 0x22e   :  { %v811_v55 = vpop.f32.mrb[0].mxu1 }
 0x22f   :  { %v279_v56 = vadd.f32 %v811_v55, %v650_v54  ;;  %v273_v57 = vpop.f32.mrb[1].mxu1 }
 0x230   :  { %v274_v58 = vadd.f32 %v650_v54, %v273_v57 }
 0x231   :  { %v283_v60 = vmax.f32 %v279_v56, 0.0 }
 0x232   :  { %v282_v59 = vmax.f32 %v274_v58, 0.0 }
 0x234   :  { %844 = vmatprep.mubr.f32.mxu0 %v282_v59 }
 0x235   :  { %845 = vmatmul.mubr.f32.vlgmr.msra.gmra.mrb[2].mxu0 %v283_v60 }
 0x236   :  { %914 = vmatprep.mubr.msk.f32.mxu0 %vm1156_vm0, %v1157_v18  ;;  %1039 = vmatpush3.bf16.msra.mxu0 %v1038_v26 }
 0x237   :  { %1040 = vmatprep.subr.bf16.mxu0 %v1155_v0 }
 0x23a   :  { %1042 = vmatpush3.bf16.msra.mxu0 %v1041_v28 }
 0x23b   :  { %1043 = vmatprep.subr.bf16.mxu0 %v1155_v0 }
 0x23e   :  { %1045 = vmatpush3.bf16.msra.mxu0 %v1044_v31 }
 0x23f   :  { %1046 = vmatprep.subr.bf16.mxu0 %v1155_v0 }
 0x242   :  { %1048 = vmatpush3.bf16.msra.mxu0 %v1047_v34  ;;  %v544_v34 = vld [vmem:[#allocation5 + $0x270] sm:$0xff] }
 0x243   :  { %1049 = vmatprep.subr.bf16.mxu0 %v1155_v0  ;;  %v1059_v36 = vpack.c.bf16 %v545_v35, %v544_v34 }
 0x246   :  { %1051 = vmatpush3.bf16.msra.mxu0 %v1050_v37  ;;  %v652_v37 = vld [vmem:[#allocation5 + $0x286] ss:$0 sm:$0xff] }
 0x247   :  { %1052 = vmatprep.subr.bf16.mxu0 %v1155_v0 }
 0x24a   :  { %1054 = vmatpush3.bf16.msra.mxu0 %v1053_v41 }
 0x24b   :  { %1055 = vmatprep.subr.bf16.mxu0 %v1155_v0 }
 0x24e   :  { %1057 = vmatpush3.bf16.msra.mxu0 %v1056_v45 }
 0x24f   :  { %1058 = vmatprep.subr.bf16.mxu0 %v1155_v0 }
 0x252   :  { %1060 = vmatpush3.bf16.msra.mxu0 %v1059_v36 }
 0x308   :  { %v846_v46 = vpop.f32.mrb[2].mxu0 }
 0x309   :  { %v373_v47 = vadd.f32 %v846_v46, %v1205_v50  ;;  %v367_v48 = vpop.f32.mrb[3].mxu0 }
 0x30a   :  { %v368_v51 = vadd.f32 %v367_v48, %v1203_v49 }
 0x30b   :  { %v385_v52 = vmul.f32 %v373_v47, %v373_v47 }
 0x30c   :  { %v376_v53 = vadd.f32 %v373_v47, %v368_v51  ;;  %v384_v54 = vmul.f32 %v368_v51, %v368_v51 }
 0x30e   :  { %v377_v55 = vrot.slane %v376_v53, 4  ;;  %v386_v56 = vadd.f32 %v385_v52, %v384_v54 }
 0x310   :  { %v378_v57 = vadd.f32 %v377_v55, %v376_v53  ;;  %v387_v58 = vrot.slane %v386_v56, 4 }
 0x312   :  { %v379_v59 = vrot.slane %v378_v57, 2  ;;  %v388_v60 = vadd.f32 %v387_v58, %v386_v56 }
 0x314   :  { %v380_v61 = vadd.f32 %v379_v59, %v378_v57  ;;  %v389_v62 = vrot.slane %v388_v60, 2 }
 0x316   :  { %v381_v63 = vrot.slane %v380_v61, 1  ;;  %v390_v1 = vadd.f32 %v389_v62, %v388_v60 }
 0x318   :  { %v382_v0 = vadd.f32 %v381_v63, %v380_v61  ;;  %v391_v2 = vrot.slane %v390_v1, 1 }
 0x31a   :  { %v383_v3 = vmul.f32 0.0625, %v382_v0  ;;  %v392_v50 = vadd.f32 %v391_v2, %v390_v1 }
 0x31c   :  { %v393_v4 = vmul.f32 0.0625, %v392_v50  ;;  %v394_v5 = vmul.f32 %v383_v3, %v383_v3  ;;  %v399_v49 = vsub.f32 %v368_v51, %v383_v3  ;;  %v400_v6 = vsub.f32 %v373_v47, %v383_v3 }
 0x31e   :  { %v395_v7 = vsub.f32 %v393_v4, %v394_v5 }
 0x320   :  { %v396_v8 = vadd.f32 1e-05, %v395_v7 }
 0x322   :  { %1073 = vrsqrt.f32 %v396_v8 }
 0x32c   :  { %v1074_v10 = vpop.eup %1073 }
 0x32d   :  { %v398_v11 = vmul.f32 %v1074_v10, %v47_v9 }
 0x32f   :  { %v404_v12 = vrot.slane %v398_v11, %v176_v43 }
 0x331   :  { %v405_v14 = vmul.f32 %v404_v12, %v399_v49  ;;  %v406_v15 = vmul.f32 %v404_v12, %v400_v6 }
 0x333   :  { %v411_v16 = vadd.f32 %v651_v13, %v405_v14  ;;  %v412_v17 = vadd.f32 %v651_v13, %v406_v15 }
 0x335   :  { %v413_v18 = vrot.slane %v411_v16, 4  ;;  %v419_v19 = vrot.slane %v412_v17, 4 }
 0x337   :  { %v414_v20 = vadd.f32 %v413_v18, %v411_v16  ;;  %v420_v21 = vadd.f32 %v419_v19, %v412_v17 }
 0x339   :  { %v415_v22 = vrot.slane %v414_v20, 2  ;;  %v421_v23 = vrot.slane %v420_v21, 2 }
 0x33b   :  { %v416_v25 = vadd.f32 %v415_v22, %v414_v20  ;;  %v422_v26 = vadd.f32 %v421_v23, %v420_v21 }
 0x33d   :  { %v417_v27 = vrot.slane %v416_v25, 1  ;;  %v423_v28 = vrot.slane %v422_v26, 1 }
 0x33f   :  { %v418_v30 = vadd.f32 %v417_v27, %v416_v25  ;;  %v424_v39 = vadd.f32 %v423_v28, %v422_v26 }
 0x341   :  { %v430_v43 = vadd.f32 %v426_v29, %v424_v39  ;;  %v429_v31 = vadd.f32 %v418_v30, %v42_v24 }
 0x343   :  { %v454_v32 = vrot.slane %v430_v43, 7 }
 0x345   :  { %v456_v33 = vsel %vm455_vm1, %v454_v32, %v429_v31 }
 0x346   :  { %880 = vmatmul.mubr.f32.vlgmr.msra.gmra.mrb[2].mxu1 %v456_v33 }
 0x419   :  { %v524_v38 = vpop.f32.mrb[2].mxu1 }
 0x41a   :  { %v525_v40 = vadd.f32 %v652_v37, %v524_v38  ;;  %v881_v41 = vpop.f32.mrb[3].mxu1 }
 0x41c   :  { %v528_v42 = vmax.f32 %v525_v40, 0.0 }
 0x41e   :  { %915 = vmatmul.mubr.f32.vlgmr.msra.gmra.mrb[4].mxu0 %v528_v42 }
 0x4f1   :  { %v616_v45 = vpop.f32.mrb[4].mxu0 }
 0x4f2   :  { %v617_v46 = vadd.f32 %v653_v44, %v616_v45  ;;  %v916_v47 = vpop.f32.mrb[5].mxu0 }
 0x4f4   :  { %v621_v48 = vsel %vm620_vm2, %v617_v46, -inf }
 0x4f5   :  { %622 = vmax.xlane.f32.xlu0 %v621_v48 }
 0x582   :  { %v623_v51 = vpop.xlane.xlu0 %622 }
 0x583   :  { %v624_v52 = vsub.f32 %v617_v46, %v623_v51 }
 0x585   :  { %v625_v53 = vmul.f32 1.442695, %v624_v52 }
 0x587   :  { %1075 = vpow2.f32 %v625_v53 }
 0x591   :  { %v1076_v54 = vpop.eup %1075 }
 0x592   :  { %v627_v55 = vsel %vm620_vm2, %v1076_v54, 0.0 }
 0x593   :  { %628 = vadd.xlane.f32.xlu0 %v627_v55 }
 0x620   :  { %v629_v56 = vpop.xlane.xlu0 %628 }
 0x621   :  { %1077 = vrcp.f32 %v629_v56 }
 0x62b   :  { %v1078_v57 = vpop.eup %1077 }
 0x62c   :  { %v631_v58 = vmul.f32 %v1078_v57, %v1076_v54 }
 0x62e   :  { %632 = vst.msk [vmem:[#allocation7] sm:$0x3] %vm620_vm2, %v631_v58 }
 0x62f   :  { %1134 = shalt.err (!%p1131_p6)
}
 0x630   :  { %s1135_s10 = scalar_lea.hbm %s1246_s2, 32 }
 0x631   :  { %p1136_p7 = scmp.ne.s32.totalorder %s1246_s2, %s1135_s10  ;;  %p1139_p8 = scmp.lt.u32.totalorder %s1135_s10, %s1246_s2 }
 0x633   :  { %p1141_p9 = pnand %p1139_p8, %p1136_p7 }
 0x635   :  { %1144 = shalt.err (!%p1141_p9)
}
 0x636   :  { %642 = dma.vmem_to_hbm [thread:$0]  %s640_s6, 32, %s1246_s2, [#allocation4]  }
 0x637   :  { %1149 = dma.done.wait [#allocation4], 32  }
 0x638   :  { %1150 = vsyncadd [#allocation4], 4294967264 }
 0x639   :  { %646 = vsyncpa [#allocation3], 1 }
 0x63a   :  { %647 = vsyncpa [#allocation6], 1 }
 0x63b   :  { %648 = vsyncpa [#allocation4], 1 }

</bundles_post_ra>
